<compile_context>
chip_gen: v7x
topology: tpu7x:2x2x1
jax: 0.10.0
libtpu: 0.0.40
codegen_flags: <defaults>
</compile_context>

<pallas_src>
import jax
import jax.numpy as jnp
from jax.experimental import pallas as pl
from jax.experimental.pallas import tpu as pltpu

_NEG_BIG = -1.0e30  # effectively -inf for padded class columns


def _round_up(x, m):
    return ((x + m - 1) // m) * m


def classify_kernel(x_ref, w_ref, b_ref, o_ref):
    # x_ref: (TB, Hp)  w_ref: (Hp, Cp) compute dtype  b_ref: (1, Cp) f32
    # o_ref: (TB, Cp)
    x = x_ref[...].astype(w_ref.dtype)  # cast to compute dtype (no-op if equal)
    logits = jnp.dot(x, w_ref[...], preferred_element_type=jnp.float32)
    logits = logits + b_ref[...]        # bias already f32

    # Numerically stable softmax along the class dim, all in f32.
    m = jnp.max(logits, axis=-1, keepdims=True)
    e = jnp.exp(logits - m)
    denom = jnp.sum(e, axis=-1, keepdims=True)
    probs = e / denom                   # exact divide (approx vrcp was too lossy)

    o_ref[...] = probs.astype(o_ref.dtype)


def init_classifier_params(weight, bias, *, compute_dtype=jnp.bfloat16):
    """One-time preparation of PyTorch nn.Linear params into the kernel layout.

    weight: (C, H)  -- PyTorch nn.Linear layout
    bias:   (C,)
    Returns:
      w_prepared:    (Hp, Cp) in compute_dtype; Hp, Cp padded to multiples of
                     128, padded entries zero.
      bias_prepared: (1, Cp) float32; padded class columns set to -1e30 so they
                     vanish in the softmax.
    """
    C, H = weight.shape
    Cp = _round_up(C, 128)
    Hp = _round_up(H, 128)

    w_t = jnp.asarray(weight).T.astype(compute_dtype)        # (H, C)
    if (Hp, Cp) != (H, C):
        w_t = jnp.pad(w_t, ((0, Hp - H), (0, Cp - C)))

    b = jnp.asarray(bias).astype(jnp.float32)
    if Cp != C:
        b = jnp.pad(b, (0, Cp - C), constant_values=_NEG_BIG)
    return w_t, b.reshape(1, Cp)


def torch_classify_forward(pooler_out, w_prepared, bias_prepared, num_classes,
                           *, block_b=256):
    """softmax(pooler_out @ weight.T + bias, axis=-1)

    pooler_out:    (B, H)
    w_prepared:    (Hp, Cp)  from init_classifier_params
    bias_prepared: (1, Cp)   from init_classifier_params
    returns        (B, num_classes) probabilities in pooler_out.dtype
    """
    B, H = pooler_out.shape
    Hp, Cp = w_prepared.shape
    out_dtype = pooler_out.dtype

    # Batch tile: sublane-aligned, at most block_b, and split into >= 2 grid
    # steps whenever the batch allows it (v7x megacore sharding of "parallel").
    B8 = _round_up(max(B, 1), 8)
    TB = min(block_b, max(8, _round_up(pl.cdiv(B8, 2), 8)))
    Bp = _round_up(B8, TB)

    x = pooler_out
    if Bp != B or Hp != H:
        x = jnp.pad(x, ((0, Bp - B), (0, Hp - H)))

    cd_size = jnp.dtype(w_prepared.dtype).itemsize
    io_size = jnp.dtype(out_dtype).itemsize

    cost = pl.CostEstimate(
        flops=2 * Bp * Hp * Cp,
        transcendentals=Bp * Cp,
        bytes_accessed=(Bp * Hp * io_size + Hp * Cp * cd_size + Cp * 4
                        + Bp * Cp * io_size),
    )

    # VMEM budget: single-buffered weight + bias, double-buffered x / out tiles.
    vmem_needed = (Hp * Cp * cd_size + Cp * 4
                   + 2 * TB * Hp * io_size + 2 * TB * Cp * io_size)
    vmem_limit = int(min(max(2 * vmem_needed, 16 << 20), 64 << 20))

    out = pl.pallas_call(
        classify_kernel,
        out_shape=jax.ShapeDtypeStruct((Bp, Cp), out_dtype),
        grid=(Bp // TB,),
        in_specs=[
            # Batch-tiled activations (double-buffered by default).
            pl.BlockSpec((TB, Hp), lambda i: (i, 0)),
            # Constant index_map -> resident; single-buffer to halve VMEM use.
            pl.BlockSpec((Hp, Cp), lambda i: (0, 0),
                         pipeline_mode=pl.Buffered(1)),
            pl.BlockSpec((1, Cp), lambda i: (0, 0),
                         pipeline_mode=pl.Buffered(1)),
        ],
        out_specs=pl.BlockSpec((TB, Cp), lambda i: (i, 0)),
        compiler_params=pltpu.CompilerParams(
            dimension_semantics=("parallel",),
            vmem_limit_bytes=vmem_limit,
        ),
        cost_estimate=cost,
    )(x, w_prepared, bias_prepared)

    return out[:B, :num_classes]


if __name__ == "__main__":
    # Small shapes consistent with torch_classify(num_classes, hidden_size).
    batch = 8
    hidden_size = 32
    num_classes = 16

    key = jax.random.PRNGKey(0)
    k_x, k_w, k_b = jax.random.split(key, 3)

    # Mimic nn.Linear init scale: U(-1/sqrt(H), 1/sqrt(H)); PyTorch (C, H) layout.
    bound = hidden_size ** -0.5
    pooler_out = jax.random.normal(k_x, (batch, hidden_size), dtype=jnp.float32)
    weight = jax.random.uniform(k_w, (num_classes, hidden_size),
                                dtype=jnp.float32, minval=-bound, maxval=bound)
    bias = jax.random.uniform(k_b, (num_classes,),
                              dtype=jnp.float32, minval=-bound, maxval=bound)

    # Reference in plain JAX (f32).
    ref = jax.nn.softmax(pooler_out @ weight.T + bias, axis=-1)

    # Recommended production path: bf16 weight, f32 accumulate/softmax.
    w_p, b_p = init_classifier_params(weight, bias)        # once, at model init
    out = torch_classify_forward(pooler_out, w_p, b_p, num_classes)
    out = jax.block_until_ready(out)
    assert out.shape == (batch, num_classes)
    assert jnp.allclose(jnp.sum(out, axis=-1), 1.0, atol=1e-3)
    assert jnp.allclose(out, ref, atol=1e-2)                # bf16 matmul tolerance

    # Full-precision path for a tight numerical check of the kernel itself.
    w_p32, b_p32 = init_classifier_params(weight, bias, compute_dtype=jnp.float32)
    out32 = jax.block_until_ready(
        torch_classify_forward(pooler_out, w_p32, b_p32, num_classes))
    assert jnp.allclose(out32, ref, atol=1e-4, rtol=1e-4)
    assert jnp.allclose(jnp.sum(out32, axis=-1), 1.0, atol=1e-4)

    print("KERNEL_OK")
</pallas_src>

<mosaic_0001>
module attributes {stable_mosaic.version = 11 : i64} {
  func.func @classify_kernel(%arg0: i32, %arg1: memref<8x128xf32, #tpu.memory_space<vmem>>, %arg2: memref<128x128xbf16, #tpu.memory_space<vmem>>, %arg3: memref<1x128xf32, #tpu.memory_space<vmem>>, %arg4: memref<8x128xf32, #tpu.memory_space<vmem>>) attributes {dimension_semantics = [#tpu.dimension_semantics<parallel>], iteration_bounds = array<i64: 1>, scalar_prefetch = 0 : i64, scratch_operands = 0 : i64, tpu.core_type = #tpu.core_type<tc>, window_params = [{transform_indices = @transform_0, window_bounds = array<i64: 8, 128>}, {pipeline_mode = #tpu.pipeline_mode<synchronous>, transform_indices = @transform_1, window_bounds = array<i64: 128, 128>}, {pipeline_mode = #tpu.pipeline_mode<synchronous>, transform_indices = @transform_2, window_bounds = array<i64: 1, 128>}, {transform_indices = @transform_3, window_bounds = array<i64: 8, 128>}]} {
    %c0 = arith.constant 0 : index
    %c0_0 = arith.constant 0 : index
    %0 = vector.load %arg1[%c0, %c0_0] : memref<8x128xf32, #tpu.memory_space<vmem>>, vector<8x128xf32>
    %1 = arith.truncf %0 : vector<8x128xf32> to vector<8x128xbf16>
    %c0_1 = arith.constant 0 : index
    %c0_2 = arith.constant 0 : index
    %2 = vector.load %arg2[%c0_1, %c0_2] : memref<128x128xbf16, #tpu.memory_space<vmem>>, vector<128x128xbf16>
    %cst = arith.constant dense<0.000000e+00> : vector<8x128xf32>
    %3 = tpu.matmul %1, %2, %cst {dimension_numbers = #tpu.dot_dimension_numbers<[1], [0], [0], [1], [0, 0, 1, 1], [], []>} : vector<8x128xbf16>, vector<128x128xbf16>, vector<8x128xf32> -> vector<8x128xf32>
    %c0_3 = arith.constant 0 : index
    %c0_4 = arith.constant 0 : index
    %4 = vector.load %arg3[%c0_3, %c0_4] : memref<1x128xf32, #tpu.memory_space<vmem>>, vector<1x128xf32>
    %5 = vector.broadcast %4 : vector<1x128xf32> to vector<8x128xf32>
    %6 = arith.addf %3, %5 : vector<8x128xf32>
    %cst_5 = arith.constant dense<0xFF800000> : vector<8xf32>
    %7 = vector.multi_reduction <maximumf>, %6, %cst_5 [1] : vector<8x128xf32> to vector<8xf32>
    %8 = vector.shape_cast %7 : vector<8xf32> to vector<8x1xf32>
    %9 = vector.broadcast %8 : vector<8x1xf32> to vector<8x128xf32>
    %10 = arith.subf %6, %9 : vector<8x128xf32>
    %11 = math.exp %10 : vector<8x128xf32>
    %cst_6 = arith.constant dense<0.000000e+00> : vector<8xf32>
    %12 = vector.multi_reduction <add>, %11, %cst_6 [1] : vector<8x128xf32> to vector<8xf32>
    %13 = vector.shape_cast %12 : vector<8xf32> to vector<8x1xf32>
    %14 = vector.broadcast %13 : vector<8x1xf32> to vector<8x128xf32>
    %15 = arith.divf %11, %14 : vector<8x128xf32>
    %c0_7 = arith.constant 0 : index
    %c0_8 = arith.constant 0 : index
    %16 = vector.load %arg4[%c0_7, %c0_8] : memref<8x128xf32, #tpu.memory_space<vmem>>, vector<8x128xf32>
    tpu.vector_store %arg4[%c0_7, %c0_8], %15 {strides = array<i32>} : memref<8x128xf32, #tpu.memory_space<vmem>>, vector<8x128xf32>,
    return
  }
  func.func @transform_0(%arg0: i32) -> (i32, i32) {
    %c0_i32 = arith.constant 0 : i32
    %c0_i32_0 = arith.constant 0 : i32
    return %arg0, %c0_i32 : i32, i32
  }
  func.func @transform_1(%arg0: i32) -> (i32, i32) {
    %c0_i32 = arith.constant 0 : i32
    %c0_i32_0 = arith.constant 0 : i32
    %c0_i32_1 = arith.constant 0 : i32
    return %c0_i32, %c0_i32_0 : i32, i32
  }
  func.func @transform_2(%arg0: i32) -> (i32, i32) {
    %c0_i32 = arith.constant 0 : i32
    %c0_i32_0 = arith.constant 0 : i32
    %c0_i32_1 = arith.constant 0 : i32
    return %c0_i32, %c0_i32_0 : i32, i32
  }
  func.func @transform_3(%arg0: i32) -> (i32, i32) {
    %c0_i32 = arith.constant 0 : i32
    %c0_i32_0 = arith.constant 0 : i32
    return %arg0, %c0_i32 : i32, i32
  }
}

</mosaic_0001>

<bundles_post_ra>
// kernel: tpu_custom_call.1
= control target key start
LH: loop header
LB: loop body
LE: loop exit
PB: predicated region body
PF: predicated region fallthrough
CT: control target
= control target key end

     0   :  { %8 = vsyncpa [#allocation3], 0  ;;  %s383_s0 = inlined_call_operand.hbm [shape: f32[8,128], index: 0, kind: input, shape index: {}]   ;;  %s384_s1 = inlined_call_operand.hbm [shape: bf16[128,128], index: 1, kind: input, shape index: {}]   ;;  %s385_s2 = inlined_call_operand.vmem [shape: f32[1,128], index: 2, kind: input, shape index: {}]   ;;  %s386_s3 = inlined_call_operand.hbm [shape: f32[8,128], index: 3, kind: output, shape index: {}]  }
   0x1   :  { %9 = vsyncpa [#allocation6], 0 }
   0x2   :  { %10 = vsyncpa [#allocation4], 0  ;;  %s310_s12 = smov [#allocation2]   ;;  %s311_s14 = smov [#allocation5]  }
   0x3   :  { %s17_s13 = sshll.u32 %s310_s12, 4  ;;  %s26_s15 = sshll.u32 %s311_s14, 4  ;;  %s18_s13 = int_to_ptr.vmem [resolvable:$true] %s17_s13  ;;  %s337_s15 = int_to_ptr.vmem [resolvable:$true] %s26_s15 }
   0x4   :  { %s238_s18 = scalar_lea.hbm %s383_s0, 128 }
   0x5   :  { %p239_p0 = scmp.ne.s32.totalorder %s383_s0, %s238_s18  ;;  %p242_p1 = scmp.lt.u32.totalorder %s238_s18, %s383_s0 }
   0x7   :  { %p244_p2 = pnand %p242_p1, %p239_p0 }
   0x9   :  { %247 = shalt.err (!%p244_p2)
}
   0xa   :  { %s248_s23 = scalar_lea.vmem %s18_s13, 128  ;;  %p253_p4 = scmp.lt.s32.totalorder %s18_s13, %s18_s13 }
   0xb   :  { %p249_p3 = scmp.ne.s32.totalorder %s18_s13, %s248_s23  ;;  %p254_p5 = scmp.lt.s32.totalorder %s248_s23, %s248_s23 }
   0xd   :  { %p255_p6 = por %p254_p5, %p253_p4 }
   0xf   :  { %p256_p7 = pnand %p255_p6, %p249_p3 }
  0x11   :  { %259 = shalt.err (!%p256_p7)
}
  0x12   :  { %20 = dma.hbm_to_vmem [thread:$0]  %s383_s0, 128, %s18_s13, [#allocation3]  }
  0x13   :  { %s260_s28 = scalar_lea.hbm %s384_s1, 1024 }
  0x14   :  { %p261_p8 = scmp.ne.s32.totalorder %s384_s1, %s260_s28  ;;  %p264_p9 = scmp.lt.u32.totalorder %s260_s28, %s384_s1 }
  0x16   :  { %p266_p10 = pnand %p264_p9, %p261_p8 }
  0x18   :  { %269 = shalt.err (!%p266_p10)
}
  0x19   :  { %s270_s6 = scalar_lea.vmem %s337_s15, 1024  ;;  %p275_p12 = scmp.lt.s32.totalorder %s337_s15, %s337_s15 }
  0x1a   :  { %p271_p11 = scmp.ne.s32.totalorder %s337_s15, %s270_s6  ;;  %p276_p13 = scmp.lt.s32.totalorder %s270_s6, %s270_s6 }
  0x1c   :  { %p277_p0 = por %p276_p13, %p275_p12 }
  0x1e   :  { %p278_p1 = pnand %p277_p0, %p271_p11 }
  0x20   :  { %281 = shalt.err (!%p278_p1)
}
  0x21   :  { %s312_s0 = smov 64   ;;  %s313_s7 = smov 4  }
  0x22   :  { %32 = dma.hbm_to_vmem [thread:$0]  %s384_s1, 1024, %s337_s15, [#allocation6], %s312_s0, %s312_s0, %s313_s7  }
  0x23   :  { %304 = dma.done.wait [#allocation3], 128  }
  0x24   :  { %305 = vsyncadd [#allocation3], 4294967168 }
  0x25   :  { %306 = dma.done.wait [#allocation6], 1024  }
  0x26   :  { %307 = vsyncadd [#allocation6], 4294966272  ;;  %v314_v0 = vmov 0.0   ;;  %vm315_vm0 = vmmov 0   ;;  %v226_v1 = vld [vmem:[#allocation5] sm:$0xff]   ;;  %v227_v2 = vld [vmem:[#allocation5 + $0x8] sm:$0xff]  }
  0x27   :  { %199 = vmatprep.subr.bf16.mxu0 %v314_v0  ;;  %215 = vmatprep.mubr.msk.bf16.mxu0 %vm315_vm0, %v314_v0  ;;  %v228_v3 = vld [vmem:[#allocation5 + $0x10] sm:$0xff]   ;;  %v229_v4 = vld [vmem:[#allocation5 + $0x18] sm:$0xff]   ;;  %v230_v5 = vld [vmem:[#allocation5 + $0x20] sm:$0xff]   ;;  %s316_s11 = smov [#allocation7]  }
  0x28   :  { %200 = vmatpush3.bf16.msra.mxu0 %v226_v1  ;;  %v231_v6 = vld [vmem:[#allocation5 + $0x28] sm:$0xff]   ;;  %v232_v7 = vld [vmem:[#allocation5 + $0x30] sm:$0xff]   ;;  %v233_v8 = vld [vmem:[#allocation5 + $0x38] sm:$0xff]   ;;  %s171_s12 = sshll.u32 %s316_s11, 4  ;;  %s172_s12 = int_to_ptr.vmem [resolvable:$true] %s171_s12 }
  0x29   :  { %201 = vmatprep.subr.bf16.mxu0 %v314_v0  ;;  %v42_v9 = vld [vmem:[#allocation2] sm:$0xff]  ;;  %p287_p3 = scmp.lt.s32.totalorder %s172_s12, %s172_s12 }
  0x2a   :  { %v43_v10 = vpack.c.bf16 %v42_v9, %v42_v9  ;;  %v181_v11 = vld [vmem:[%s385_s2] ss:$0 sm:$0xff]  ;;  %s282_s2 = scalar_lea.vmem %s172_s12, 128 }
  0x2b   :  { %p283_p2 = scmp.ne.s32.totalorder %s172_s12, %s282_s2  ;;  %p288_p4 = scmp.lt.s32.totalorder %s282_s2, %s282_s2 }
  0x2c   :  { %202 = vmatpush3.bf16.msra.mxu0 %v227_v2 }
  0x2d   :  { %203 = vmatprep.subr.bf16.mxu0 %v314_v0  ;;  %p289_p5 = por %p288_p4, %p287_p3 }
  0x2f   :  { %p290_p6 = pnand %p289_p5, %p283_p2 }
  0x30   :  { %204 = vmatpush3.bf16.msra.mxu0 %v228_v3 }
  0x31   :  { %205 = vmatprep.subr.bf16.mxu0 %v314_v0 }
  0x34   :  { %206 = vmatpush3.bf16.msra.mxu0 %v229_v4 }
  0x35   :  { %207 = vmatprep.subr.bf16.mxu0 %v314_v0 }
  0x38   :  { %208 = vmatpush3.bf16.msra.mxu0 %v230_v5 }
  0x39   :  { %209 = vmatprep.subr.bf16.mxu0 %v314_v0 }
  0x3c   :  { %210 = vmatpush3.bf16.msra.mxu0 %v231_v6 }
  0x3d   :  { %211 = vmatprep.subr.bf16.mxu0 %v314_v0 }
  0x40   :  { %212 = vmatpush3.bf16.msra.mxu0 %v232_v7 }
  0x41   :  { %213 = vmatprep.subr.bf16.mxu0 %v314_v0 }
  0x44   :  { %214 = vmatpush3.bf16.msra.mxu0 %v233_v8 }
  0x47   :  { %216 = vmatmul.mubr.bf16.vlgmr.msra.gmra.mrb[0].mxu0 %v43_v10 }
 0x11a   :  { %v149_v12 = vpop.f32.mrb[0].mxu0 }
 0x11b   :  { %v150_v13 = vadd.f32 %v181_v11, %v149_v12  ;;  %v217_v14 = vpop.f32.mrb[1].mxu0 }
 0x11c   :  { %v152_v15 = vpop.f32.mrb[2].mxu0 }
 0x11d   :  { %155 = vmax.xlane.f32.xlu0 %v150_v13  ;;  %v218_v16 = vpop.f32.mrb[3].mxu0 }
 0x1aa   :  { %v156_v17 = vpop.xlane.xlu0 %155 }
 0x1ab   :  { %v157_v18 = vsub.f32 %v150_v13, %v156_v17 }
 0x1ad   :  { %v158_v19 = vmul.f32 1.442695, %v157_v18 }
 0x1af   :  { %234 = vpow2.f32 %v158_v19 }
 0x1b9   :  { %v235_v20 = vpop.eup %234 }
 0x1ba   :  { %160 = vadd.xlane.f32.xlu0 %v235_v20 }
 0x247   :  { %v161_v21 = vpop.xlane.xlu0 %160 }
 0x248   :  { %236 = vrcp.f32 %v161_v21 }
 0x252   :  { %v237_v22 = vpop.eup %236 }
 0x253   :  { %v163_v23 = vmul.f32 %v237_v22, %v235_v20 }
 0x255   :  { %164 = vst [vmem:[#allocation7] sm:$0xff] %v163_v23 }
 0x256   :  { %293 = shalt.err (!%p290_p6)
}
 0x257   :  { %s294_s15 = scalar_lea.hbm %s386_s3, 128 }
 0x258   :  { %p295_p7 = scmp.ne.s32.totalorder %s386_s3, %s294_s15  ;;  %p298_p8 = scmp.lt.u32.totalorder %s294_s15, %s386_s3 }
 0x25a   :  { %p300_p9 = pnand %p298_p8, %p295_p7 }
 0x25c   :  { %303 = shalt.err (!%p300_p9)
}
 0x25d   :  { %174 = dma.vmem_to_hbm [thread:$0]  %s172_s12, 128, %s386_s3, [#allocation4]  }
 0x25e   :  { %308 = dma.done.wait [#allocation4], 128  }
 0x25f   :  { %309 = vsyncadd [#allocation4], 4294967168 }
 0x260   :  { %178 = vsyncpa [#allocation3], 1 }
 0x261   :  { %179 = vsyncpa [#allocation6], 1 }
 0x262   :  { %180 = vsyncpa [#allocation4], 1 }

</bundles_post_ra>
